<compile_context>
chip_gen: v7x
topology: tpu7x:2x2x1
jax: 0.10.0
libtpu: 0.0.40
codegen_flags: <defaults>
</compile_context>

<pallas_src>
import jax
import jax.numpy as jnp
import numpy as np
from jax.experimental import pallas as pl
from jax.experimental.pallas import tpu as pltpu

# ----------------------------- configuration -------------------------------
B             = 2     # batch
MAX_POST      = 8     # P
EMB_DIM       = 32    # D
P_HEADS       = 4
P_DH          = EMB_DIM // P_HEADS
UP_HEADS      = 2
U_HEADS       = 4
U_DH          = EMB_DIM // U_HEADS
P_GAT_LAYERS  = 1
UP_GAT_LAYERS = 1
U_GAT_LAYERS  = 1
FINAL_HIDDEN  = 32
NUM_CLASSES   = 2
NUM_MLPS      = 2
N_TRAITS      = 4
P1            = MAX_POST + 1

BP    = B * MAX_POST            # 16 post rows (batch-major)
BN    = B * N_TRAITS            # 8 (batch, trait) rows
LP    = P_HEADS * BP            # 64 packed post-score lanes (head-major)
LU    = U_HEADS * BN            # 32 packed trait-score lanes
NCOMB = BP + B                  # 18 key rows for UP_GAT (posts + cnodes)
D4    = N_TRAITS * EMB_DIM      # 128
C4    = N_TRAITS * NUM_CLASSES  # 8

# ------------------------ packed-slab static layout -------------------------
_SLAB_W = 128

_LAYOUT = [
    # activations / data-dependent masks
    ("feat",       (BP, EMB_DIM)),
    ("cnode",      (B, EMB_DIM)),
    ("p_valid",    (BP, LP)),
    ("p_fill",     (BP, LP)),
    ("up_valid",   (BN, NCOMB)),
    ("up_fill",    (BN, NCOMB)),
    # P_GAT weights + helpers
    ("pgat_W",     (EMB_DIM, EMB_DIM)),
    ("pA1E",       (EMB_DIM, LP)),
    ("pA2E",       (EMB_DIM, LP)),
    ("p_diag",     (BP, LP)),
    ("p_segones",  (LP, LP)),
    ("p_blksel",   (LP, BP)),
    ("p_colmask",  (LP, EMB_DIM)),
    # UP_GAT weights + helpers
    ("up_Wq",      (EMB_DIM, D4)),
    ("up_bq",      (1, D4)),
    ("up_Wk",      (EMB_DIM, D4)),
    ("up_bk",      (1, D4)),
    ("expB_T",     (BN, B)),
    ("trait_mask", (BN, D4)),
    ("spread4",    (EMB_DIM, D4)),
    ("Wo_stack",   (D4, EMB_DIM)),
    ("bo_rows",    (BN, EMB_DIM)),
    # U_GAT weights + helpers
    ("ugat_W",     (EMB_DIM, EMB_DIM)),
    ("uA1E",       (EMB_DIM, LU)),
    ("uA2E",       (EMB_DIM, LU)),
    ("u_diag",     (BN, LU)),
    ("u_segones",  (LU, LU)),
    ("u_blksel",   (LU, BN)),
    ("u_colmask",  (LU, EMB_DIM)),
    ("u_valid",    (BN, LU)),
    # shared MLP + per-trait classifier
    ("mlp_W0",     (EMB_DIM, FINAL_HIDDEN)),
    ("mlp_b0",     (1, FINAL_HIDDEN)),
    ("mlp_W1",     (FINAL_HIDDEN, FINAL_HIDDEN)),
    ("mlp_b1",     (1, FINAL_HIDDEN)),
    ("fcf_W",      (FINAL_HIDDEN, C4)),
    ("fcf_b",      (1, C4)),
    ("sel",        (BN, C4)),
    ("summat",     (B, BN)),
]

_SHAPES = dict(_LAYOUT)


def _pad8(n):
    return ((n + 7) // 8) * 8


_OFF = {}
_r = 0
for _name, (_h, _w) in _LAYOUT:
    _OFF[_name] = _r
    _r += _pad8(_h)
_SLAB_ROWS = _r                # multiple of 8 by construction (~984 rows)


# ------------------------------- kernel ------------------------------------
def _mm(a, b):
    # default MXU precision (no 'highest' multi-pass decomposition)
    return jnp.dot(a, b, preferred_element_type=jnp.float32)


def _blk(ref, name):
    off = _OFF[name]
    h, w = _SHAPES[name]
    return ref[off:off + h, 0:w]        # static slice, zero-cost addressing


def pd_han_kernel(slab_ref, out_ref):
    inv_sqrt_d = 1.0 / (EMB_DIM ** 0.5)
    ld = lambda name: _blk(slab_ref, name)

    feat = ld("feat")                    # (BP, D)  posts, batch-major
    cnode = ld("cnode")                  # (B,  D)  central user nodes

    # ---------------- P_GAT (post graph), batch+head merged -----------------
    pgat_W = ld("pgat_W")
    pA1E = ld("pA1E")                    # (D, LP) block-diag attn vec, lane-packed
    pA2E = ld("pA2E")
    p_diag = ld("p_diag")                # (BP, LP) picks ak[j,h] per lane
    p_segones = ld("p_segones")          # (LP, LP) per-head-segment all-ones
    p_blksel = ld("p_blksel")            # (LP, BP) tiles qk per head
    p_colmask = ld("p_colmask")          # (LP, D)  per-head output columns
    p_valid = ld("p_valid")              # (BP, LP) 1 = keep score
    p_fill = ld("p_fill")                # (BP, LP) -1e-8 intra-mask / -1e9 x-batch

    f = feat
    for _ in range(P_GAT_LAYERS):
        qk = _mm(f, pgat_W)                                       # (BP, D)
        aqE = _mm(qk, pA1E)                                       # (BP, LP)
        akE = _mm(qk, pA2E)                                       # (BP, LP)
        ak_row = jnp.sum(akE * p_diag, axis=0, keepdims=True)     # (1, LP)
        # tanh-bounded scores -> no max-subtraction needed
        s = jnp.tanh(aqE + ak_row) * p_valid + p_fill             # (BP, LP)
        e = jnp.exp(s)
        den = _mm(e, p_segones)                                   # (BP, LP)
        att = e * pl.reciprocal(den, approx=True)
        qk_bd = _mm(p_blksel, qk) * p_colmask                     # (LP, D)
        f = f + jnp.tanh(_mm(att, qk_bd))                         # (BP, D)

    # ---------------- UP_GAT x 4 traits, merged over (batch, trait) ---------
    q_all = _mm(cnode, ld("up_Wq")) + ld("up_bq")                 # (B, 4D)
    q_sel = _mm(ld("expB_T"), q_all) * ld("trait_mask")           # (BN, 4D)
    comb = jnp.concatenate([f, cnode], axis=0)                    # (NCOMB, D)
    k_all = _mm(comb, ld("up_Wk")) + ld("up_bk")                  # (NCOMB, 4D)
    sim = jax.lax.dot_general(q_sel, k_all, (((1,), (1,)), ((), ())),
                              preferred_element_type=jnp.float32) * inv_sqrt_d
    sim = sim * ld("up_valid") + ld("up_fill")                    # (BN, NCOMB)
    m = jnp.max(sim, axis=-1, keepdims=True)                      # unbounded scores
    e = jnp.exp(sim - m)
    att = e * pl.reciprocal(jnp.sum(e, axis=-1, keepdims=True), approx=True)
    heads = _mm(att, comb)                                        # (BN, D)
    # W_o pre-folded ([head,head] @ Wo == head @ (Wo_top+Wo_bot)); applied as
    # one block-diagonal (4D, D) matmul for all traits & batches.
    heads_bd = _mm(heads, ld("spread4")) * ld("trait_mask")       # (BN, 4D)
    g = _mm(heads_bd, ld("Wo_stack")) + ld("bo_rows")             # (BN, D)

    # ---------------- U_GAT (trait graph), batch+head merged ----------------
    ugat_W = ld("ugat_W")
    uA1E = ld("uA1E")
    uA2E = ld("uA2E")
    u_diag = ld("u_diag")
    u_segones = ld("u_segones")
    u_blksel = ld("u_blksel")
    u_colmask = ld("u_colmask")
    u_valid = ld("u_valid")              # zeroes cross-batch weights directly

    for _ in range(U_GAT_LAYERS):
        qk = _mm(g, ugat_W)                                       # (BN, D)
        aqE = _mm(qk, uA1E)                                       # (BN, LU)
        akE = _mm(qk, uA2E)                                       # (BN, LU)
        ak_row = jnp.sum(akE * u_diag, axis=0, keepdims=True)     # (1, LU)
        e = jnp.exp(jnp.tanh(aqE + ak_row)) * u_valid             # (BN, LU)
        den = _mm(e, u_segones)
        att = e * pl.reciprocal(den, approx=True)
        qk_bd = _mm(u_blksel, qk) * u_colmask                     # (LU, D)
        g = g + jnp.tanh(_mm(att, qk_bd))                         # (BN, D)

    # ------------- shared MLP + per-trait classifier, fully batched ---------
    x = jnp.maximum(_mm(g, ld("mlp_W0")) + ld("mlp_b0"), 0.0)     # (BN, FH)
    for _ in range(NUM_MLPS - 1):
        x = jnp.maximum(_mm(x, ld("mlp_W1")) + ld("mlp_b1"), 0.0)
    logits_full = _mm(x, ld("fcf_W"))                             # (BN, 4C)
    picked = logits_full * ld("sel")     # row (b,t) keeps only its trait block
    out_ref[...] = _mm(ld("summat"), picked) + ld("fcf_b")        # (B, 4C)


# ------------------------------- wrapper ------------------------------------
def _blockdiag_cols(a_half, n_heads, dh):
    # a_half: (dh, H) -> (H*dh, H) with block h (rows h*dh:(h+1)*dh) in col h
    eye = jnp.eye(n_heads, dtype=a_half.dtype)
    return (a_half[None, :, :] * eye[:, None, :]).reshape(n_heads * dh, n_heads)


@jax.jit
def pd_han_forward(p_mask, feature, c_node, params):
    f32 = jnp.float32
    pm = p_mask.astype(f32)
    blocks = {}

    blocks["feat"] = feature.reshape(BP, EMB_DIM).astype(f32)
    blocks["cnode"] = c_node.reshape(B, EMB_DIM).astype(f32)

    # ---- P_GAT merged-batch masks (arithmetic form, tiled across heads) ----
    same_pp = np.kron(np.eye(B, dtype=np.float32),
                      np.ones((MAX_POST, MAX_POST), np.float32))      # (BP,BP)
    pmf = pm.reshape(BP)
    adj_big = pmf[:, None] * pmf[None, :] * same_pp                    # (BP,BP)
    keep = adj_big != 0.0
    fill = jnp.where(keep, 0.0,
                     jnp.where(same_pp != 0.0, -1e-8, -1e9))  # keep upstream -1e-8
    blocks["p_valid"] = jnp.tile(keep.astype(f32), (1, P_HEADS))
    blocks["p_fill"] = jnp.tile(fill, (1, P_HEADS))

    # ---- UP_GAT merged masks (keys = 16 posts then 2 cnodes) ---------------
    row_b = np.repeat(np.arange(B), N_TRAITS)
    col_b = np.concatenate([np.repeat(np.arange(B), MAX_POST), np.arange(B)])
    same_up = (row_b[:, None] == col_b[None, :]).astype(np.float32)    # (BN,NCOMB)
    col_valid = jnp.concatenate([pmf, jnp.ones((B,), f32)])            # (NCOMB,)
    col_valid = jnp.broadcast_to(col_valid[None, :], (BN, NCOMB))
    blocks["up_valid"] = jnp.where(same_up != 0.0,
                                   (col_valid != 0.0).astype(f32), 0.0)
    blocks["up_fill"] = jnp.where(same_up != 0.0,
                                  jnp.where(col_valid != 0.0, 0.0, 1e-8),
                                  -1e9)

    # ---- P_GAT weights + static helpers ------------------------------------
    E_p = np.kron(np.eye(P_HEADS, dtype=np.float32), np.ones((1, BP), np.float32))
    blocks["pgat_W"] = params["pgat_W"]
    blocks["pA1E"] = _blockdiag_cols(params["pgat_A"][:P_DH], P_HEADS, P_DH) @ E_p
    blocks["pA2E"] = _blockdiag_cols(params["pgat_A"][P_DH:], P_HEADS, P_DH) @ E_p
    blocks["p_diag"] = np.tile(np.eye(BP, dtype=np.float32), (1, P_HEADS))
    blocks["p_segones"] = np.kron(np.eye(P_HEADS, dtype=np.float32),
                                  np.ones((BP, BP), np.float32))
    blocks["p_blksel"] = np.kron(np.ones((P_HEADS, 1), np.float32),
                                 np.eye(BP, dtype=np.float32))
    blocks["p_colmask"] = np.kron(np.eye(P_HEADS, dtype=np.float32),
                                  np.ones((BP, P_DH), np.float32))

    # ---- UP_GAT: 4 traits concatenated lane-dense ---------------------------
    blocks["up_Wq"] = jnp.transpose(params["up_Wq"], (1, 0, 2)).reshape(EMB_DIM, D4)
    blocks["up_bq"] = params["up_bq"].reshape(1, D4)
    blocks["up_Wk"] = jnp.transpose(params["up_Wk"], (1, 0, 2)).reshape(EMB_DIM, D4)
    blocks["up_bk"] = params["up_bk"].reshape(1, D4)
    blocks["expB_T"] = np.kron(np.eye(B, dtype=np.float32),
                               np.ones((N_TRAITS, 1), np.float32))
    blocks["trait_mask"] = np.tile(
        np.kron(np.eye(N_TRAITS, dtype=np.float32), np.ones((1, EMB_DIM), np.float32)),
        (B, 1))
    blocks["spread4"] = np.tile(np.eye(EMB_DIM, dtype=np.float32), (1, N_TRAITS))
    wo_fold = params["up_Wo"][:, :EMB_DIM, :] + params["up_Wo"][:, EMB_DIM:, :]
    blocks["Wo_stack"] = wo_fold.reshape(D4, EMB_DIM)
    blocks["bo_rows"] = jnp.tile(params["up_bo"].reshape(N_TRAITS, EMB_DIM), (B, 1))

    # ---- U_GAT weights + static helpers -------------------------------------
    E_u = np.kron(np.eye(U_HEADS, dtype=np.float32), np.ones((1, BN), np.float32))
    blocks["ugat_W"] = params["ugat_W"]
    blocks["uA1E"] = _blockdiag_cols(params["ugat_A"][:U_DH], U_HEADS, U_DH) @ E_u
    blocks["uA2E"] = _blockdiag_cols(params["ugat_A"][U_DH:], U_HEADS, U_DH) @ E_u
    blocks["u_diag"] = np.tile(np.eye(BN, dtype=np.float32), (1, U_HEADS))
    blocks["u_segones"] = np.kron(np.eye(U_HEADS, dtype=np.float32),
                                  np.ones((BN, BN), np.float32))
    blocks["u_blksel"] = np.kron(np.ones((U_HEADS, 1), np.float32),
                                 np.eye(BN, dtype=np.float32))
    blocks["u_colmask"] = np.kron(np.eye(U_HEADS, dtype=np.float32),
                                  np.ones((BN, U_DH), np.float32))
    blocks["u_valid"] = np.tile(
        np.kron(np.eye(B, dtype=np.float32), np.ones((N_TRAITS, N_TRAITS), np.float32)),
        (1, U_HEADS))

    # ---- shared MLP + per-trait classifier -----------------------------------
    blocks["mlp_W0"] = params["mlp_W0"]
    blocks["mlp_b0"] = params["mlp_b0"]
    blocks["mlp_W1"] = params["mlp_W1"]
    blocks["mlp_b1"] = params["mlp_b1"]
    blocks["fcf_W"] = jnp.transpose(params["fcf_W"], (1, 0, 2)).reshape(FINAL_HIDDEN, C4)
    blocks["fcf_b"] = params["fcf_b"].reshape(1, C4)
    blocks["sel"] = np.tile(
        np.kron(np.eye(N_TRAITS, dtype=np.float32),
                np.ones((1, NUM_CLASSES), np.float32)),
        (B, 1))
    blocks["summat"] = np.kron(np.eye(B, dtype=np.float32),
                               np.ones((1, N_TRAITS), np.float32))

    # ---- pack everything into one lane-dense VMEM slab (single DMA) ---------
    slab = jnp.zeros((_SLAB_ROWS, _SLAB_W), f32)
    for name, (h, w) in _LAYOUT:
        slab = slab.at[_OFF[name]:_OFF[name] + h, 0:w].set(
            jnp.asarray(blocks[name], f32).reshape(h, w))

    vmem = pl.BlockSpec(memory_space=pltpu.MemorySpace.VMEM)
    out = pl.pallas_call(
        pd_han_kernel,
        out_shape=jax.ShapeDtypeStruct((B, C4), jnp.float32),
        in_specs=[vmem],
        out_specs=vmem,
    )(slab)
    # split the merged (B, 4*C) output back into the module's 4 logit tensors
    return tuple(out[:, t * NUM_CLASSES:(t + 1) * NUM_CLASSES] for t in range(N_TRAITS))


# ---------------------------- pure-JAX reference ----------------------------
def pd_han_reference(p_mask, feature, c_node, params):
    bsz, P, D = feature.shape
    adj = p_mask[:, :, None] * p_mask[:, None, :]

    f = feature
    for _ in range(P_GAT_LAYERS):
        residual = f
        qk = (f @ params["pgat_W"]).reshape(bsz, P, P_HEADS, P_DH)
        A = params["pgat_A"]
        aq = jnp.einsum("bqhd,dh->bqh", qk, A[:P_DH])
        ak = jnp.einsum("bkhd,dh->bkh", qk, A[P_DH:])
        score = jnp.tanh(aq[:, :, None, :] + ak[:, None, :, :])
        score = jnp.where((1.0 - adj)[:, :, :, None] != 0.0, -1e-8, score)
        att = jax.nn.softmax(score, axis=-2)
        hid = jnp.tanh(jnp.einsum("bqkh,bkhd->bqhd", att, qk))
        f = residual + hid.reshape(bsz, P, D)

    npm = jnp.concatenate([p_mask, jnp.ones((bsz, 1), p_mask.dtype)], axis=1)
    comb = jnp.concatenate([f, c_node], axis=1)

    u_feats = []
    for t in range(N_TRAITS):
        u = c_node
        for _ in range(UP_GAT_LAYERS):
            q = c_node @ params["up_Wq"][t] + params["up_bq"][t]
            k = comb @ params["up_Wk"][t] + params["up_bk"][t]
            sim = jnp.einsum("bqd,bkd->bqk", q, k) / (D ** 0.5)
            sim = jnp.where((1.0 - npm)[:, None, :] != 0.0, 1e-8, sim)
            att = jax.nn.softmax(sim, axis=2)
            head = att @ comb
            mh = jnp.concatenate([head] * UP_HEADS, axis=-1)
            u = mh @ params["up_Wo"][t] + params["up_bo"][t]
        u_feats.append(u[:, 0, :])
    g = jnp.stack(u_feats, axis=1)                                       # (B,4,D)

    for _ in range(U_GAT_LAYERS):
        residual = g
        qk = (g @ params["ugat_W"]).reshape(bsz, N_TRAITS, U_HEADS, U_DH)
        A = params["ugat_A"]
        aq = jnp.einsum("bqhd,dh->bqh", qk, A[:U_DH])
        ak = jnp.einsum("bkhd,dh->bkh", qk, A[U_DH:])
        score = jnp.tanh(aq[:, :, None, :] + ak[:, None, :, :])
        att = jax.nn.softmax(score, axis=-2)
        hid = jnp.tanh(jnp.einsum("bqkh,bkhd->bqhd", att, qk))
        g = residual + hid.reshape(bsz, N_TRAITS, D)

    logits = []
    for t in range(N_TRAITS):
        x = g[:, t, :]
        x = jax.nn.relu(x @ params["mlp_W0"] + params["mlp_b0"])
        for _ in range(NUM_MLPS - 1):
            x = jax.nn.relu(x @ params["mlp_W1"] + params["mlp_b1"])
        logits.append(x @ params["fcf_W"][t] + params["fcf_b"][t])
    return tuple(logits)


# ------------------------------- params init --------------------------------
def init_params(key):
    keys = jax.random.split(key, 16)

    def w(k, shape, scale=0.1):
        return (scale * jax.random.normal(k, shape)).astype(jnp.float32)

    return dict(
        pgat_W=w(keys[0], (EMB_DIM, EMB_DIM)),
        pgat_A=w(keys[1], (2 * P_DH, P_HEADS)),
        up_Wq=w(keys[2], (N_TRAITS, EMB_DIM, EMB_DIM)),
        up_bq=w(keys[3], (N_TRAITS, 1, EMB_DIM)),
        up_Wk=w(keys[4], (N_TRAITS, EMB_DIM, EMB_DIM)),
        up_bk=w(keys[5], (N_TRAITS, 1, EMB_DIM)),
        up_Wo=w(keys[6], (N_TRAITS, EMB_DIM * UP_HEADS, EMB_DIM)),
        up_bo=w(keys[7], (N_TRAITS, 1, EMB_DIM)),
        ugat_W=w(keys[8], (EMB_DIM, EMB_DIM)),
        ugat_A=w(keys[9], (2 * U_DH, U_HEADS)),
        mlp_W0=w(keys[10], (EMB_DIM, FINAL_HIDDEN)),
        mlp_b0=w(keys[11], (1, FINAL_HIDDEN)),
        mlp_W1=w(keys[12], (FINAL_HIDDEN, FINAL_HIDDEN)),
        mlp_b1=w(keys[13], (1, FINAL_HIDDEN)),
        fcf_W=w(keys[14], (N_TRAITS, FINAL_HIDDEN, NUM_CLASSES)),
        fcf_b=w(keys[15], (N_TRAITS, 1, NUM_CLASSES)),
    )


# ---------------------------------- main -------------------------------------
if __name__ == "__main__":
    key = jax.random.PRNGKey(0)
    k_feat, k_cnode, k_params = jax.random.split(key, 3)

    feature = jax.random.normal(k_feat, (B, MAX_POST, EMB_DIM), jnp.float32)
    c_node = jax.random.normal(k_cnode, (B, 1, EMB_DIM), jnp.float32)
    # deterministic 0/1 post mask: batch b has (5 + 2*b) valid posts
    lengths = jnp.array([[5], [7]], dtype=jnp.int32)
    p_mask = (jnp.arange(MAX_POST)[None, :] < lengths).astype(jnp.float32)

    params = init_params(k_params)

    logits = pd_han_forward(p_mask, feature, c_node, params)
    logits = jax.block_until_ready(logits)

    # ground-truth reference at highest matmul precision; the kernel runs at
    # default MXU precision with approx reciprocals, so allow rounding headroom.
    with jax.default_matmul_precision("highest"):
        ref_logits = pd_han_reference(p_mask, feature, c_node, params)
    ref_logits = jax.block_until_ready(ref_logits)

    for out, ref in zip(logits, ref_logits):
        assert out.shape == (B, NUM_CLASSES)
        assert bool(jnp.all(jnp.isfinite(out)))
        assert float(jnp.max(jnp.abs(out - ref))) < 2e-2

    print("KERNEL_OK")
</pallas_src>

<mosaic_0001>
module attributes {stable_mosaic.version = 11 : i64} {
  func.func @pd_han_kernel(%arg0: memref<984x128xf32, #tpu.memory_space<vmem>>, %arg1: memref<2x8xf32, #tpu.memory_space<vmem>>) attributes {dimension_semantics = [], scalar_prefetch = 0 : i64, scratch_operands = 0 : i64, tpu.core_type = #tpu.core_type<tc>} {
    %c0 = arith.constant 0 : index
    %c0_0 = arith.constant 0 : index
    %0 = vector.load %arg0[%c0, %c0_0] : memref<984x128xf32, #tpu.memory_space<vmem>>, vector<16x32xf32>
    %c16 = arith.constant 16 : index
    %c0_1 = arith.constant 0 : index
    %1 = vector.load %arg0[%c16, %c0_1] : memref<984x128xf32, #tpu.memory_space<vmem>>, vector<2x32xf32>
    %c72 = arith.constant 72 : index
    %c0_2 = arith.constant 0 : index
    %2 = vector.load %arg0[%c72, %c0_2] : memref<984x128xf32, #tpu.memory_space<vmem>>, vector<32x32xf32>
    %c104 = arith.constant 104 : index
    %c0_3 = arith.constant 0 : index
    %3 = vector.load %arg0[%c104, %c0_3] : memref<984x128xf32, #tpu.memory_space<vmem>>, vector<32x64xf32>
    %c136 = arith.constant 136 : index
    %c0_4 = arith.constant 0 : index
    %4 = vector.load %arg0[%c136, %c0_4] : memref<984x128xf32, #tpu.memory_space<vmem>>, vector<32x64xf32>
    %c168 = arith.constant 168 : index
    %c0_5 = arith.constant 0 : index
    %5 = vector.load %arg0[%c168, %c0_5] : memref<984x128xf32, #tpu.memory_space<vmem>>, vector<16x64xf32>
    %c184 = arith.constant 184 : index
    %c0_6 = arith.constant 0 : index
    %6 = vector.load %arg0[%c184, %c0_6] : memref<984x128xf32, #tpu.memory_space<vmem>>, vector<64x64xf32>
    %c248 = arith.constant 248 : index
    %c0_7 = arith.constant 0 : index
    %7 = vector.load %arg0[%c248, %c0_7] : memref<984x128xf32, #tpu.memory_space<vmem>>, vector<64x16xf32>
    %c312 = arith.constant 312 : index
    %c0_8 = arith.constant 0 : index
    %8 = vector.load %arg0[%c312, %c0_8] : memref<984x128xf32, #tpu.memory_space<vmem>>, vector<64x32xf32>
    %c24 = arith.constant 24 : index
    %c0_9 = arith.constant 0 : index
    %9 = vector.load %arg0[%c24, %c0_9] : memref<984x128xf32, #tpu.memory_space<vmem>>, vector<16x64xf32>
    %c40 = arith.constant 40 : index
    %c0_10 = arith.constant 0 : index
    %10 = vector.load %arg0[%c40, %c0_10] : memref<984x128xf32, #tpu.memory_space<vmem>>, vector<16x64xf32>
    %cst = arith.constant dense<0.000000e+00> : vector<16x32xf32>
    %11 = tpu.matmul %0, %2, %cst {dimension_numbers = #tpu.dot_dimension_numbers<[1], [0], [0], [1], [0, 0, 1, 1], [], []>} : vector<16x32xf32>, vector<32x32xf32>, vector<16x32xf32> -> vector<16x32xf32>
    %cst_11 = arith.constant dense<0.000000e+00> : vector<16x64xf32>
    %12 = tpu.matmul %11, %3, %cst_11 {dimension_numbers = #tpu.dot_dimension_numbers<[1], [0], [0], [1], [0, 0, 1, 1], [], []>} : vector<16x32xf32>, vector<32x64xf32>, vector<16x64xf32> -> vector<16x64xf32>
    %cst_12 = arith.constant dense<0.000000e+00> : vector<16x64xf32>
    %13 = tpu.matmul %11, %4, %cst_12 {dimension_numbers = #tpu.dot_dimension_numbers<[1], [0], [0], [1], [0, 0, 1, 1], [], []>} : vector<16x32xf32>, vector<32x64xf32>, vector<16x64xf32> -> vector<16x64xf32>
    %14 = arith.mulf %13, %5 : vector<16x64xf32>
    %cst_13 = arith.constant dense<0.000000e+00> : vector<64xf32>
    %15 = vector.multi_reduction <add>, %14, %cst_13 [0] : vector<16x64xf32> to vector<64xf32>
    %16 = vector.shape_cast %15 : vector<64xf32> to vector<1x64xf32>
    %17 = vector.broadcast %16 : vector<1x64xf32> to vector<16x64xf32>
    %18 = arith.addf %12, %17 : vector<16x64xf32>
    %19 = math.tanh %18 : vector<16x64xf32>
    %20 = arith.mulf %19, %9 : vector<16x64xf32>
    %21 = arith.addf %20, %10 : vector<16x64xf32>
    %22 = math.exp %21 : vector<16x64xf32>
    %cst_14 = arith.constant dense<0.000000e+00> : vector<16x64xf32>
    %23 = tpu.matmul %22, %6, %cst_14 {dimension_numbers = #tpu.dot_dimension_numbers<[1], [0], [0], [1], [0, 0, 1, 1], [], []>} : vector<16x64xf32>, vector<64x64xf32>, vector<16x64xf32> -> vector<16x64xf32>
    %24 = tpu.reciprocal %23 {approx = true} : vector<16x64xf32> -> vector<16x64xf32>
    %25 = arith.mulf %22, %24 : vector<16x64xf32>
    %cst_15 = arith.constant dense<0.000000e+00> : vector<64x32xf32>
    %26 = tpu.matmul %7, %11, %cst_15 {dimension_numbers = #tpu.dot_dimension_numbers<[1], [0], [0], [1], [0, 0, 1, 1], [], []>} : vector<64x16xf32>, vector<16x32xf32>, vector<64x32xf32> -> vector<64x32xf32>
    %27 = arith.mulf %26, %8 : vector<64x32xf32>
    %cst_16 = arith.constant dense<0.000000e+00> : vector<16x32xf32>
    %28 = tpu.matmul %25, %27, %cst_16 {dimension_numbers = #tpu.dot_dimension_numbers<[1], [0], [0], [1], [0, 0, 1, 1], [], []>} : vector<16x64xf32>, vector<64x32xf32>, vector<16x32xf32> -> vector<16x32xf32>
    %29 = math.tanh %28 : vector<16x32xf32>
    %30 = arith.addf %0, %29 : vector<16x32xf32>
    %c376 = arith.constant 376 : index
    %c0_17 = arith.constant 0 : index
    %31 = vector.load %arg0[%c376, %c0_17] : memref<984x128xf32, #tpu.memory_space<vmem>>, vector<32x128xf32>
    %cst_18 = arith.constant dense<0.000000e+00> : vector<2x128xf32>
    %32 = tpu.matmul %1, %31, %cst_18 {dimension_numbers = #tpu.dot_dimension_numbers<[1], [0], [0], [1], [0, 0, 1, 1], [], []>} : vector<2x32xf32>, vector<32x128xf32>, vector<2x128xf32> -> vector<2x128xf32>
    %c408 = arith.constant 408 : index
    %c0_19 = arith.constant 0 : index
    %33 = vector.load %arg0[%c408, %c0_19] : memref<984x128xf32, #tpu.memory_space<vmem>>, vector<1x128xf32>
    %34 = vector.broadcast %33 : vector<1x128xf32> to vector<2x128xf32>
    %35 = arith.addf %32, %34 : vector<2x128xf32>
    %c456 = arith.constant 456 : index
    %c0_20 = arith.constant 0 : index
    %36 = vector.load %arg0[%c456, %c0_20] : memref<984x128xf32, #tpu.memory_space<vmem>>, vector<8x2xf32>
    %cst_21 = arith.constant dense<0.000000e+00> : vector<8x128xf32>
    %37 = tpu.matmul %36, %35, %cst_21 {dimension_numbers = #tpu.dot_dimension_numbers<[1], [0], [0], [1], [0, 0, 1, 1], [], []>} : vector<8x2xf32>, vector<2x128xf32>, vector<8x128xf32> -> vector<8x128xf32>
    %c464 = arith.constant 464 : index
    %c0_22 = arith.constant 0 : index
    %38 = vector.load %arg0[%c464, %c0_22] : memref<984x128xf32, #tpu.memory_space<vmem>>, vector<8x128xf32>
    %39 = arith.mulf %37, %38 : vector<8x128xf32>
    %40 = tpu.concatenate %30, %1 in 0 : vector<16x32xf32>, vector<2x32xf32> -> vector<18x32xf32>
    %c416 = arith.constant 416 : index
    %c0_23 = arith.constant 0 : index
    %41 = vector.load %arg0[%c416, %c0_23] : memref<984x128xf32, #tpu.memory_space<vmem>>, vector<32x128xf32>
    %cst_24 = arith.constant dense<0.000000e+00> : vector<18x128xf32>
    %42 = tpu.matmul %40, %41, %cst_24 {dimension_numbers = #tpu.dot_dimension_numbers<[1], [0], [0], [1], [0, 0, 1, 1], [], []>} : vector<18x32xf32>, vector<32x128xf32>, vector<18x128xf32> -> vector<18x128xf32>
    %c448 = arith.constant 448 : index
    %c0_25 = arith.constant 0 : index
    %43 = vector.load %arg0[%c448, %c0_25] : memref<984x128xf32, #tpu.memory_space<vmem>>, vector<1x128xf32>
    %44 = vector.broadcast %43 : vector<1x128xf32> to vector<18x128xf32>
    %45 = arith.addf %42, %44 : vector<18x128xf32>
    %cst_26 = arith.constant dense<0.000000e+00> : vector<8x18xf32>
    %46 = tpu.matmul %39, %45, %cst_26 {dimension_numbers = #tpu.dot_dimension_numbers<[1], [1], [0], [0], [0, 0, 1, 0], [], []>} : vector<8x128xf32>, vector<18x128xf32>, vector<8x18xf32> -> vector<8x18xf32>
    %cst_27 = arith.constant 0.176776692 : f32
    %47 = vector.broadcast %cst_27 : f32 to vector<8x18xf32>
    %48 = arith.mulf %46, %47 : vector<8x18xf32>
    %c56 = arith.constant 56 : index
    %c0_28 = arith.constant 0 : index
    %49 = vector.load %arg0[%c56, %c0_28] : memref<984x128xf32, #tpu.memory_space<vmem>>, vector<8x18xf32>
    %50 = arith.mulf %48, %49 : vector<8x18xf32>
    %c64 = arith.constant 64 : index
    %c0_29 = arith.constant 0 : index
    %51 = vector.load %arg0[%c64, %c0_29] : memref<984x128xf32, #tpu.memory_space<vmem>>, vector<8x18xf32>
    %52 = arith.addf %50, %51 : vector<8x18xf32>
    %cst_30 = arith.constant dense<0xFF800000> : vector<8xf32>
    %53 = vector.multi_reduction <maximumf>, %52, %cst_30 [1] : vector<8x18xf32> to vector<8xf32>
    %54 = vector.shape_cast %53 : vector<8xf32> to vector<8x1xf32>
    %55 = vector.broadcast %54 : vector<8x1xf32> to vector<8x18xf32>
    %56 = arith.subf %52, %55 : vector<8x18xf32>
    %57 = math.exp %56 : vector<8x18xf32>
    %cst_31 = arith.constant dense<0.000000e+00> : vector<8xf32>
    %58 = vector.multi_reduction <add>, %57, %cst_31 [1] : vector<8x18xf32> to vector<8xf32>
    %59 = vector.shape_cast %58 : vector<8xf32> to vector<8x1xf32>
    %60 = tpu.reciprocal %59 {approx = true} : vector<8x1xf32> -> vector<8x1xf32>
    %61 = vector.broadcast %60 : vector<8x1xf32> to vector<8x18xf32>
    %62 = arith.mulf %57, %61 : vector<8x18xf32>
    %cst_32 = arith.constant dense<0.000000e+00> : vector<8x32xf32>
    %63 = tpu.matmul %62, %40, %cst_32 {dimension_numbers = #tpu.dot_dimension_numbers<[1], [0], [0], [1], [0, 0, 1, 1], [], []>} : vector<8x18xf32>, vector<18x32xf32>, vector<8x32xf32> -> vector<8x32xf32>
    %c472 = arith.constant 472 : index
    %c0_33 = arith.constant 0 : index
    %64 = vector.load %arg0[%c472, %c0_33] : memref<984x128xf32, #tpu.memory_space<vmem>>, vector<32x128xf32>
    %cst_34 = arith.constant dense<0.000000e+00> : vector<8x128xf32>
    %65 = tpu.matmul %63, %64, %cst_34 {dimension_numbers = #tpu.dot_dimension_numbers<[1], [0], [0], [1], [0, 0, 1, 1], [], []>} : vector<8x32xf32>, vector<32x128xf32>, vector<8x128xf32> -> vector<8x128xf32>
    %c464_35 = arith.constant 464 : index
    %c0_36 = arith.constant 0 : index
    %66 = vector.load %arg0[%c464_35, %c0_36] : memref<984x128xf32, #tpu.memory_space<vmem>>, vector<8x128xf32>
    %67 = arith.mulf %65, %66 : vector<8x128xf32>
    %c504 = arith.constant 504 : index
    %c0_37 = arith.constant 0 : index
    %68 = vector.load %arg0[%c504, %c0_37] : memref<984x128xf32, #tpu.memory_space<vmem>>, vector<128x32xf32>
    %cst_38 = arith.constant dense<0.000000e+00> : vector<8x32xf32>
    %69 = tpu.matmul %67, %68, %cst_38 {dimension_numbers = #tpu.dot_dimension_numbers<[1], [0], [0], [1], [0, 0, 1, 1], [], []>} : vector<8x128xf32>, vector<128x32xf32>, vector<8x32xf32> -> vector<8x32xf32>
    %c632 = arith.constant 632 : index
    %c0_39 = arith.constant 0 : index
    %70 = vector.load %arg0[%c632, %c0_39] : memref<984x128xf32, #tpu.memory_space<vmem>>, vector<8x32xf32>
    %71 = arith.addf %69, %70 : vector<8x32xf32>
    %c640 = arith.constant 640 : index
    %c0_40 = arith.constant 0 : index
    %72 = vector.load %arg0[%c640, %c0_40] : memref<984x128xf32, #tpu.memory_space<vmem>>, vector<32x32xf32>
    %c672 = arith.constant 672 : index
    %c0_41 = arith.constant 0 : index
    %73 = vector.load %arg0[%c672, %c0_41] : memref<984x128xf32, #tpu.memory_space<vmem>>, vector<32x32xf32>
    %c704 = arith.constant 704 : index
    %c0_42 = arith.constant 0 : index
    %74 = vector.load %arg0[%c704, %c0_42] : memref<984x128xf32, #tpu.memory_space<vmem>>, vector<32x32xf32>
    %c736 = arith.constant 736 : index
    %c0_43 = arith.constant 0 : index
    %75 = vector.load %arg0[%c736, %c0_43] : memref<984x128xf32, #tpu.memory_space<vmem>>, vector<8x32xf32>
    %c744 = arith.constant 744 : index
    %c0_44 = arith.constant 0 : index
    %76 = vector.load %arg0[%c744, %c0_44] : memref<984x128xf32, #tpu.memory_space<vmem>>, vector<32x32xf32>
    %c776 = arith.constant 776 : index
    %c0_45 = arith.constant 0 : index
    %77 = vector.load %arg0[%c776, %c0_45] : memref<984x128xf32, #tpu.memory_space<vmem>>, vector<32x8xf32>
    %c808 = arith.constant 808 : index
    %c0_46 = arith.constant 0 : index
    %78 = vector.load %arg0[%c808, %c0_46] : memref<984x128xf32, #tpu.memory_space<vmem>>, vector<32x32xf32>
    %c840 = arith.constant 840 : index
    %c0_47 = arith.constant 0 : index
    %79 = vector.load %arg0[%c840, %c0_47] : memref<984x128xf32, #tpu.memory_space<vmem>>, vector<8x32xf32>
    %cst_48 = arith.constant dense<0.000000e+00> : vector<8x32xf32>
    %80 = tpu.matmul %71, %72, %cst_48 {dimension_numbers = #tpu.dot_dimension_numbers<[1], [0], [0], [1], [0, 0, 1, 1], [], []>} : vector<8x32xf32>, vector<32x32xf32>, vector<8x32xf32> -> vector<8x32xf32>
    %cst_49 = arith.constant dense<0.000000e+00> : vector<8x32xf32>
    %81 = tpu.matmul %80, %73, %cst_49 {dimension_numbers = #tpu.dot_dimension_numbers<[1], [0], [0], [1], [0, 0, 1, 1], [], []>} : vector<8x32xf32>, vector<32x32xf32>, vector<8x32xf32> -> vector<8x32xf32>
    %cst_50 = arith.constant dense<0.000000e+00> : vector<8x32xf32>
    %82 = tpu.matmul %80, %74, %cst_50 {dimension_numbers = #tpu.dot_dimension_numbers<[1], [0], [0], [1], [0, 0, 1, 1], [], []>} : vector<8x32xf32>, vector<32x32xf32>, vector<8x32xf32> -> vector<8x32xf32>
    %83 = arith.mulf %82, %75 : vector<8x32xf32>
    %cst_51 = arith.constant dense<0.000000e+00> : vector<32xf32>
    %84 = vector.multi_reduction <add>, %83, %cst_51 [0] : vector<8x32xf32> to vector<32xf32>
    %85 = vector.shape_cast %84 : vector<32xf32> to vector<1x32xf32>
    %86 = vector.broadcast %85 : vector<1x32xf32> to vector<8x32xf32>
    %87 = arith.addf %81, %86 : vector<8x32xf32>
    %88 = math.tanh %87 : vector<8x32xf32>
    %89 = math.exp %88 : vector<8x32xf32>
    %90 = arith.mulf %89, %79 : vector<8x32xf32>
    %cst_52 = arith.constant dense<0.000000e+00> : vector<8x32xf32>
    %91 = tpu.matmul %90, %76, %cst_52 {dimension_numbers = #tpu.dot_dimension_numbers<[1], [0], [0], [1], [0, 0, 1, 1], [], []>} : vector<8x32xf32>, vector<32x32xf32>, vector<8x32xf32> -> vector<8x32xf32>
    %92 = tpu.reciprocal %91 {approx = true} : vector<8x32xf32> -> vector<8x32xf32>
    %93 = arith.mulf %90, %92 : vector<8x32xf32>
    %cst_53 = arith.constant dense<0.000000e+00> : vector<32x32xf32>
    %94 = tpu.matmul %77, %80, %cst_53 {dimension_numbers = #tpu.dot_dimension_numbers<[1], [0], [0], [1], [0, 0, 1, 1], [], []>} : vector<32x8xf32>, vector<8x32xf32>, vector<32x32xf32> -> vector<32x32xf32>
    %95 = arith.mulf %94, %78 : vector<32x32xf32>
    %cst_54 = arith.constant dense<0.000000e+00> : vector<8x32xf32>
    %96 = tpu.matmul %93, %95, %cst_54 {dimension_numbers = #tpu.dot_dimension_numbers<[1], [0], [0], [1], [0, 0, 1, 1], [], []>} : vector<8x32xf32>, vector<32x32xf32>, vector<8x32xf32> -> vector<8x32xf32>
    %97 = math.tanh %96 : vector<8x32xf32>
    %98 = arith.addf %71, %97 : vector<8x32xf32>
    %c848 = arith.constant 848 : index
    %c0_55 = arith.constant 0 : index
    %99 = vector.load %arg0[%c848, %c0_55] : memref<984x128xf32, #tpu.memory_space<vmem>>, vector<32x32xf32>
    %cst_56 = arith.constant dense<0.000000e+00> : vector<8x32xf32>
    %100 = tpu.matmul %98, %99, %cst_56 {dimension_numbers = #tpu.dot_dimension_numbers<[1], [0], [0], [1], [0, 0, 1, 1], [], []>} : vector<8x32xf32>, vector<32x32xf32>, vector<8x32xf32> -> vector<8x32xf32>
    %c880 = arith.constant 880 : index
    %c0_57 = arith.constant 0 : index
    %101 = vector.load %arg0[%c880, %c0_57] : memref<984x128xf32, #tpu.memory_space<vmem>>, vector<1x32xf32>
    %102 = vector.broadcast %101 : vector<1x32xf32> to vector<8x32xf32>
    %103 = arith.addf %100, %102 : vector<8x32xf32>
    %cst_58 = arith.constant 0.000000e+00 : f32
    %104 = vector.broadcast %cst_58 : f32 to vector<8x32xf32>
    %105 = arith.maximumf %103, %104 : vector<8x32xf32>
    %c888 = arith.constant 888 : index
    %c0_59 = arith.constant 0 : index
    %106 = vector.load %arg0[%c888, %c0_59] : memref<984x128xf32, #tpu.memory_space<vmem>>, vector<32x32xf32>
    %cst_60 = arith.constant dense<0.000000e+00> : vector<8x32xf32>
    %107 = tpu.matmul %105, %106, %cst_60 {dimension_numbers = #tpu.dot_dimension_numbers<[1], [0], [0], [1], [0, 0, 1, 1], [], []>} : vector<8x32xf32>, vector<32x32xf32>, vector<8x32xf32> -> vector<8x32xf32>
    %c920 = arith.constant 920 : index
    %c0_61 = arith.constant 0 : index
    %108 = vector.load %arg0[%c920, %c0_61] : memref<984x128xf32, #tpu.memory_space<vmem>>, vector<1x32xf32>
    %109 = vector.broadcast %108 : vector<1x32xf32> to vector<8x32xf32>
    %110 = arith.addf %107, %109 : vector<8x32xf32>
    %cst_62 = arith.constant 0.000000e+00 : f32
    %111 = vector.broadcast %cst_62 : f32 to vector<8x32xf32>
    %112 = arith.maximumf %110, %111 : vector<8x32xf32>
    %c928 = arith.constant 928 : index
    %c0_63 = arith.constant 0 : index
    %113 = vector.load %arg0[%c928, %c0_63] : memref<984x128xf32, #tpu.memory_space<vmem>>, vector<32x8xf32>
    %cst_64 = arith.constant dense<0.000000e+00> : vector<8x8xf32>
    %114 = tpu.matmul %112, %113, %cst_64 {dimension_numbers = #tpu.dot_dimension_numbers<[1], [0], [0], [1], [0, 0, 1, 1], [], []>} : vector<8x32xf32>, vector<32x8xf32>, vector<8x8xf32> -> vector<8x8xf32>
    %c968 = arith.constant 968 : index
    %c0_65 = arith.constant 0 : index
    %115 = vector.load %arg0[%c968, %c0_65] : memref<984x128xf32, #tpu.memory_space<vmem>>, vector<8x8xf32>
    %116 = arith.mulf %114, %115 : vector<8x8xf32>
    %c976 = arith.constant 976 : index
    %c0_66 = arith.constant 0 : index
    %117 = vector.load %arg0[%c976, %c0_66] : memref<984x128xf32, #tpu.memory_space<vmem>>, vector<2x8xf32>
    %cst_67 = arith.constant dense<0.000000e+00> : vector<2x8xf32>
    %118 = tpu.matmul %117, %116, %cst_67 {dimension_numbers = #tpu.dot_dimension_numbers<[1], [0], [0], [1], [0, 0, 1, 1], [], []>} : vector<2x8xf32>, vector<8x8xf32>, vector<2x8xf32> -> vector<2x8xf32>
    %c960 = arith.constant 960 : index
    %c0_68 = arith.constant 0 : index
    %119 = vector.load %arg0[%c960, %c0_68] : memref<984x128xf32, #tpu.memory_space<vmem>>, vector<1x8xf32>
    %120 = vector.broadcast %119 : vector<1x8xf32> to vector<2x8xf32>
    %121 = arith.addf %118, %120 : vector<2x8xf32>
    %c0_69 = arith.constant 0 : index
    %c0_70 = arith.constant 0 : index
    %122 = vector.load %arg1[%c0_69, %c0_70] : memref<2x8xf32, #tpu.memory_space<vmem>>, vector<2x8xf32>
    tpu.vector_store %arg1[%c0_69, %c0_70], %121 {strides = array<i32>} : memref<2x8xf32, #tpu.memory_space<vmem>>, vector<2x8xf32>,
    return
  }
}

</mosaic_0001>

<bundles_post_ra>
// kernel: pd_han_forward.1
= control target key start
LH: loop header
LB: loop body
LE: loop exit
PB: predicated region body
PF: predicated region fallthrough
CT: control target
= control target key end

     0   :  { %vm53_vm0 = vcmask 261120   ;;  %vm398_vm1 = vcmask 130048   ;;  %vm218_vm2 = vcmask 523264   ;;  %vm2699_vm3 = vmmov 0   ;;  %s3228_s0 = inlined_call_operand.vmem [shape: f32[984,128], index: 0, kind: input, shape index: {}]   ;;  %s3229_s1 = inlined_call_operand.vmem [shape: f32[2,8], index: 1, kind: output, shape index: {}]  }
   0x1   :  { %v11_v0 = vld [vmem:[%s3228_s0 + $0x48] sm:$0xff]  ;;  %v12_v1 = vld [vmem:[%s3228_s0 + $0x50] sm:$0xff]  ;;  %v13_v2 = vld [vmem:[%s3228_s0 + $0x58] sm:$0xff]  ;;  %vm708_vm4 = vcmask 1041408   ;;  %vm704_vm5 = vcmask 15360   ;;  %vm954_vm6 = vcmask 146432  }
   0x2   :  { %v2511_v3 = vpack.c.bf16 %v12_v1, %v11_v0  ;;  %v14_v4 = vld [vmem:[%s3228_s0 + $0x60] sm:$0xff]  ;;  %v19_v7 = vld [vmem:[%s3228_s0 + $0x88] sm:$0xff]  ;;  %v20_v8 = vld [vmem:[%s3228_s0 + $0x90] sm:$0xff]  ;;  %vm1535_vm7 = vcmask 64512   ;;  %vm2036_vm8 = vcmask 58368  }
   0x3   :  { %v2726_v5 = vld [vmem:[%s3228_s0] sm:$0xff]  ;;  %v2515_v6 = vpack.c.bf16 %v14_v4, %v13_v2  ;;  %v15_v9 = vld [vmem:[%s3228_s0 + $0x68] sm:$0xff]  ;;  %v2519_v10 = vpack.c.bf16 %v20_v8, %v19_v7  ;;  %v16_v11 = vld [vmem:[%s3228_s0 + $0x70] sm:$0xff] }
   0x4   :  { %2234 = vmatprep.mubr.msk.f32.mxu0 %vm53_vm0, %v2726_v5  ;;  %2512 = vmatprep.subr.bf16.mxu0 %v2511_v3  ;;  %v21_v12 = vld [vmem:[%s3228_s0 + $0x98] sm:$0xff]  ;;  %v22_v13 = vld [vmem:[%s3228_s0 + $0xa0] sm:$0xff]  ;;  %v2527_v15 = vpack.c.bf16 %v16_v11, %v15_v9  ;;  %v2757_v18 = vld [vmem:[%s3228_s0 + $0x8] sm:$0xff] }
   0x5   :  { %2514 = vmatpush3.bf16.msra.mxu0 %v2511_v3  ;;  %v2523_v14 = vpack.c.bf16 %v22_v13, %v21_v12  ;;  %2520 = vmatprep.subr.bf16.mxu1 %v2519_v10  ;;  %v17_v16 = vld [vmem:[%s3228_s0 + $0x78] sm:$0xff]  ;;  %v18_v17 = vld [vmem:[%s3228_s0 + $0x80] sm:$0xff]  ;;  %v27_v26 = vld [vmem:[%s3228_s0 + $0xc8] sm:$0xff] }
   0x6   :  { %2516 = vmatprep.subr.bf16.mxu0 %v2515_v6  ;;  %2522 = vmatpush3.bf16.msra.mxu1 %v2519_v10  ;;  %v2531_v19 = vpack.c.bf16 %v18_v17, %v17_v16  ;;  %v25_v23 = vld [vmem:[%s3228_s0 + $0xb8] sm:$0xff]  ;;  %v26_v24 = vld [vmem:[%s3228_s0 + $0xc0] sm:$0xff]  ;;  %v28_v27 = vld [vmem:[%s3228_s0 + $0xd0] sm:$0xff] }
   0x7   :  { %2524 = vmatprep.subr.bf16.mxu1 %v2523_v14  ;;  %v2535_v25 = vpack.c.bf16 %v26_v24, %v25_v23  ;;  %v2539_v28 = vpack.c.bf16 %v28_v27, %v27_v26  ;;  %v33_v29 = vld [vmem:[%s3228_s0 + $0xf8] sm:$0xff]  ;;  %v30_v31 = vld [vmem:[%s3228_s0 + $0xe0] sm:$0xff]  ;;  %v35_v34 = vld [vmem:[%s3228_s0 + $0x108] sm:$0xff] }
   0x8   :  { %v29_v30 = vld [vmem:[%s3228_s0 + $0xd8] sm:$0xff]  ;;  %v34_v33 = vld [vmem:[%s3228_s0 + $0x100] sm:$0xff]  ;;  %v31_v35 = vld [vmem:[%s3228_s0 + $0xe8] sm:$0xff] }
   0x9   :  { %2518 = vmatpush3.bf16.msra.mxu0 %v2515_v6  ;;  %v2543_v32 = vpack.c.bf16 %v30_v31, %v29_v30  ;;  %v32_v36 = vld [vmem:[%s3228_s0 + $0xf0] sm:$0xff]  ;;  %v37_v39 = vld [vmem:[%s3228_s0 + $0x118] sm:$0xff]  ;;  %v38_v40 = vld [vmem:[%s3228_s0 + $0x120] sm:$0xff] }
   0xa   :  { %2528 = vmatprep.subr.bf16.mxu0 %v2527_v15  ;;  %2526 = vmatpush3.bf16.msra.mxu1 %v2523_v14  ;;  %v2547_v37 = vpack.c.bf16 %v32_v36, %v31_v35  ;;  %v36_v38 = vld [vmem:[%s3228_s0 + $0x110] sm:$0xff]  ;;  %v39_v41 = vld [vmem:[%s3228_s0 + $0x128] sm:$0xff]  ;;  %v49_v62 = vld [vmem:[%s3228_s0 + $0x18] sm:$0xff] }
   0xb   :  { %2536 = vmatprep.subr.bf16.mxu1 %v2535_v25  ;;  %v40_v42 = vld [vmem:[%s3228_s0 + $0x130] sm:$0xff]  ;;  %v23_v44 = vld [vmem:[%s3228_s0 + $0xa8] sm:$0xff]  ;;  %v50_v63 = vld [vmem:[%s3228_s0 + $0x20] sm:$0xff] }
   0xc   :  { %2235 = vmatmul.mubr.msk.f32.vlgmr.msra.gmra.mrb[0].mxu0 %vm53_vm0, %v2757_v18  ;;  %v24_v43 = vld [vmem:[%s3228_s0 + $0xb0] sm:$0xff]  ;;  %v51_v1 = vld [vmem:[%s3228_s0 + $0x28] sm:$0xff]  ;;  %v42_v13 = vld [vmem:[%s3228_s0 + $0x140] sm:$0xff] }
   0xd   :  { %2530 = vmatpush3.bf16.msra.mxu0 %v2527_v15  ;;  %v52_v3 = vld [vmem:[%s3228_s0 + $0x30] sm:$0xff]  ;;  %v41_v14 = vld [vmem:[%s3228_s0 + $0x138] sm:$0xff] }
   0xe   :  { %2532 = vmatprep.subr.bf16.mxu0 %v2531_v19  ;;  %v45_v30 = vld [vmem:[%s3228_s0 + $0x158] sm:$0xff]  ;;  %v48_v36 = vld [vmem:[%s3228_s0 + $0x170] sm:$0xff] }
  0x11   :  { %2534 = vmatpush3.bf16.msra.mxu0 %v2531_v19 }
  0xdf   :  { %v2236_v20 = vpop.f32.mrb[0].mxu0 }
  0xe0   :  { %v126_v21 = vpop.f32.mrb[1].mxu0 }
  0xe1   :  { %v2551_v22 = vpack.c.bf16 %v2236_v20, %v126_v21  ;;  %2245 = vmatprep.mubr.msk.f32.mxu1 %vm53_vm0, %v126_v21  ;;  %2256 = vmatprep.mubr.msk.f32.mxu0 %vm53_vm0, %v126_v21  ;;  %v43_v21 = vld [vmem:[%s3228_s0 + $0x148] sm:$0xff] }
  0xe2   :  { %2246 = vmatmul.mubr.msk.f32.vlgmr.msra.gmra.mrb[0].mxu1 %vm53_vm0, %v2236_v20  ;;  %2257 = vmatmul.mubr.msk.f32.vlgmr.msra.gmra.mrb[2].mxu0 %vm53_vm0, %v2236_v20  ;;  %v44_v20 = vld [vmem:[%s3228_s0 + $0x150] sm:$0xff] }
  0xe3   :  { %2552 = vmatprep.subr.bf16.mxu0 %v2551_v22  ;;  %2538 = vmatpush3.bf16.msra.mxu1 %v2535_v25 }
  0xe4   :  { %2554 = vmatpush3.bf16.msra.mxu0 %v2551_v22  ;;  %2540 = vmatprep.subr.bf16.mxu1 %v2539_v28 }
  0xe5   :  { %2282 = vmatprep.mubr.msk.f32.mxu0 %vm398_vm1, %v33_v29  ;;  %v46_v29 = vld [vmem:[%s3228_s0 + $0x160] sm:$0xff] }
  0xe7   :  { %2542 = vmatpush3.bf16.msra.mxu1 %v2539_v28  ;;  %2283 = vmatmul.mubr.msk.f32.vlgmr.msra.gmra.mrb[4].mxu0 %vm398_vm1, %v34_v33 }
  0xe8   :  { %2544 = vmatprep.subr.bf16.mxu1 %v2543_v32  ;;  %2285 = vmatprep.mubr.msk.f32.mxu0 %vm398_vm1, %v35_v34 }
  0xeb   :  { %2546 = vmatpush3.bf16.msra.mxu1 %v2543_v32  ;;  %2286 = vmatmul.mubr.msk.f32.gmra.mrb[6].mxu0 %vm398_vm1, %v36_v38 }
  0xec   :  { %2548 = vmatprep.subr.bf16.mxu1 %v2547_v37  ;;  %2288 = vmatprep.mubr.msk.f32.mxu0 %vm398_vm1, %v37_v39 }
  0xef   :  { %2550 = vmatpush3.bf16.msra.mxu1 %v2547_v37  ;;  %2289 = vmatmul.mubr.msk.f32.gmra.mrb[8].mxu0 %vm398_vm1, %v38_v40  ;;  %v47_v37 = vld [vmem:[%s3228_s0 + $0x168] sm:$0xff] }
  0xf0   :  { %2291 = vmatprep.mubr.msk.f32.mxu0 %vm398_vm1, %v39_v41 }
  0xf3   :  { %2292 = vmatmul.mubr.msk.f32.gmra.mrb[10].mxu0 %vm398_vm1, %v40_v42  ;;  %v621_v42 = vld [vmem:[%s3228_s0 + $0x178] sm:$0xff] }
 0x1b5   :  { %v2247_v45 = vpop.f32.mrb[0].mxu1  ;;  %v2258_v46 = vpop.f32.mrb[2].mxu0 }
 0x1b6   :  { %v217_v47 = vmul.f32 %v2247_v45, %v24_v43  ;;  %v207_v48 = vpop.f32.mrb[1].mxu1  ;;  %v294_v49 = vpop.f32.mrb[3].mxu0  ;;  %v622_v43 = vld [vmem:[%s3228_s0 + $0x180] sm:$0xff]  ;;  %v2698_v45 = vmov 0.0|0.0  }
 0x1b7   :  { %v216_v50 = vmul.f32 %v207_v48, %v23_v44  ;;  %v623_v44 = vld [vmem:[%s3228_s0 + $0x188] sm:$0xff]  ;;  %2571 = vmatprep.subr.bf16.mxu1 %v2698_v45  ;;  %v2700_v48 = vmov 0.0  }
 0x1b8   :  { %v220_v51 = vsel %vm218_vm2, %v217_v47, 0.0  ;;  %v624_v47 = vld [vmem:[%s3228_s0 + $0x190] sm:$0xff] }
 0x1b9   :  { %v219_v52 = vsel %vm218_vm2, %v216_v50, 0.0  ;;  %v2893_v50 = vld [vmem:[%s3228_s0 + $0x10] sm:$0x3] }
 0x1ba   :  { %v221_v53 = vadd.f32 %v220_v51, %v219_v52  ;;  %v2284_v15 = vpop.f32.mrb[4].mxu0 }
 0x1bb   :  { %v529_v16 = vmul.f32 %v2284_v15, %v42_v13  ;;  %v489_v17 = vpop.f32.mrb[5].mxu0 }
 0x1bc   :  { %v222_v54 = vrot.slane %v221_v53, 4  ;;  %v528_v19 = vmul.f32 %v489_v17, %v41_v14  ;;  %v2064_v14 = vld [vmem:[%s3228_s0 + $0x1c0] ss:$0 sm:$0xff] }
 0x1be   :  { %v223_v55 = vadd.f32 %v222_v54, %v221_v53  ;;  %v2555_v22 = vpack.c.bf16 %v529_v16, %v528_v19  ;;  %v2287_v23 = vpop.f32.mrb[6].mxu0 }
 0x1bf   :  { %v531_v24 = vmul.f32 %v2287_v23, %v44_v20  ;;  %v499_v25 = vpop.f32.mrb[7].mxu0 }
 0x1c0   :  { %v224_v56 = vrot.slane %v223_v55, 2  ;;  %v530_v26 = vmul.f32 %v499_v25, %v43_v21  ;;  %2556 = vmatprep.subr.bf16.mxu0 %v2555_v22 }
 0x1c1   :  { %2558 = vmatpush3.bf16.msra.mxu0 %v2555_v22 }
 0x1c2   :  { %v225_v57 = vadd.f32 %v224_v56, %v223_v55  ;;  %v2559_v27 = vpack.c.bf16 %v531_v24, %v530_v26  ;;  %v2290_v28 = vpop.f32.mrb[8].mxu0  ;;  %v2949_v24 = vld [vmem:[%s3228_s0 + $0x1d0] sm:$0xff] }
 0x1c3   :  { %v509_v31 = vpop.f32.mrb[9].mxu0  ;;  %v533_v32 = vmul.f32 %v2290_v28, %v46_v29 }
 0x1c4   :  { %v226_v58 = vrot.slane %v225_v57, 1  ;;  %2560 = vmatprep.subr.bf16.mxu0 %v2559_v27  ;;  %v532_v33 = vmul.f32 %v509_v31, %v45_v30  ;;  %v952_v30 = vld [vmem:[%s3228_s0 + $0x40] sm:$0xff] }
 0x1c5   :  { %2562 = vmatpush3.bf16.msra.mxu0 %v2559_v27  ;;  %v950_v27 = vld [vmem:[%s3228_s0 + $0x38] sm:$0xff] }
 0x1c6   :  { %v227_v59 = vadd.f32 %v226_v58, %v225_v57  ;;  %v2563_v34 = vpack.c.bf16 %v533_v32, %v532_v33  ;;  %v2293_v35 = vpop.f32.mrb[10].mxu0  ;;  %v784_v57 = vld [vmem:[%s3228_s0 + $0x1a0] sm:$0xff]  ;;  %v785_v58 = vld [vmem:[%s3228_s0 + $0x1a8] sm:$0xff] }
 0x1c7   :  { %v519_v38 = vpop.f32.mrb[11].mxu0  ;;  %v535_v39 = vmul.f32 %v2293_v35, %v48_v36 }
 0x1c8   :  { %v295_v60 = vadd.f32 %v294_v49, %v227_v59  ;;  %v300_v61 = vadd.f32 %v2258_v46, %v227_v59  ;;  %v534_v40 = vmul.f32 %v519_v38, %v47_v37  ;;  %2564 = vmatprep.subr.bf16.mxu0 %v2563_v34  ;;  %v2572_v46 = vpack.c.bf16 %v622_v43, %v621_v42  ;;  %v1044_v43 = vld [vmem:[%s3228_s0 + $0x1f0] sm:$0xff] }
 0x1c9   :  { %2566 = vmatpush3.bf16.msra.mxu0 %v2563_v34  ;;  %v2575_v49 = vpack.c.bf16 %v624_v47, %v623_v44  ;;  %v2578_v59 = vpack.c.bf16 %v785_v58, %v784_v57  ;;  %v1124_v57 = vld [vmem:[%s3228_s0 + $0x220] sm:$0xff] }
 0x1ca   :  { %2670 = vtanh.f32 %v295_v60  ;;  %v2567_v41 = vpack.c.bf16 %v535_v39, %v534_v40  ;;  %v786_v60 = vld [vmem:[%s3228_s0 + $0x1b0] sm:$0xff]  ;;  %v1041_v39 = vld [vmem:[%s3228_s0 + $0x1d8] sm:$0xff]  ;;  %v1042_v40 = vld [vmem:[%s3228_s0 + $0x1e0] sm:$0xff] }
 0x1cb   :  { %2672 = vtanh.f32 %v300_v61  ;;  %v787_v61 = vld [vmem:[%s3228_s0 + $0x1b8] sm:$0xff]  ;;  %v2590_v42 = vpack.c.bf16 %v1042_v40, %v1041_v39  ;;  %v1219_v39 = vld [vmem:[%s3228_s0 + $0x2e8] sm:$0xff]  ;;  %v1220_v40 = vld [vmem:[%s3228_s0 + $0x2f0] sm:$0xff] }
 0x1cc   :  { %2568 = vmatprep.subr.bf16.mxu0 %v2567_v41 }
 0x1cd   :  { %2570 = vmatpush3.bf16.msra.mxu0 %v2567_v41  ;;  %v1043_v41 = vld [vmem:[%s3228_s0 + $0x1e8] sm:$0xff] }
 0x1ce   :  { %2577 = vmatprep.subr.bf16.mxu0 %v2698_v45  ;;  %v2593_v44 = vpack.c.bf16 %v1044_v43, %v1043_v41  ;;  %v1221_v41 = vld [vmem:[%s3228_s0 + $0x2f8] sm:$0xff]  ;;  %v1222_v43 = vld [vmem:[%s3228_s0 + $0x300] sm:$0xff] }
 0x1d4   :  { %v2671_v0 = vpop.eup %2670 }
 0x1d5   :  { %v2673_v2 = vpop.eup %2672  ;;  %v305_v4 = vmul.f32 %v2671_v0, %v49_v62  ;;  %v2581_v62 = vpack.c.bf16 %v787_v61, %v786_v60  ;;  %v1126_v60 = vld [vmem:[%s3228_s0 + $0x230] sm:$0xff] }
 0x1d6   :  { %v306_v6 = vmul.f32 %v2673_v2, %v50_v63  ;;  %v2060_v63 = vld [vmem:[%s3228_s0 + $0x198] ss:$0 sm:$0xff] }
 0x1d7   :  { %v307_v7 = vadd.f32 %v305_v4, %v51_v1 }
 0x1d8   :  { %v308_v8 = vadd.f32 %v306_v6, %v52_v3  ;;  %v703_v3 = vld [vmem:[%s3228_s0 + $0x1c8] sm:$0xff] }
 0x1d9   :  { %v309_v9 = vmul.f32 1.442695, %v307_v7 }
 0x1da   :  { %v311_v10 = vmul.f32 1.442695, %v308_v8 }
 0x1db   :  { %2674 = vpow2.f32 %v309_v9 }
 0x1dc   :  { %2676 = vpow2.f32 %v311_v10 }
 0x1e5   :  { %v2841_v11 = vpop.eup %2674 }
 0x1e6   :  { %v2843_v12 = vpop.eup %2676  ;;  %2275 = vmatprep.mubr.msk.f32.mxu1 %vm218_vm2, %v2841_v11 }
 0x1e7   :  { %2276 = vmatmul.mubr.msk.f32.vlgmr.msra.gmra.mrb[2].mxu1 %vm218_vm2, %v2843_v12 }
 0x1e8   :  { %2321 = vmatprep.mubr.msk.f32.mxu1 %vm2699_vm3, %v2700_v48  ;;  %2573 = vmatpush3.bf16.msra.mxu1 %v2572_v46 }
 0x1e9   :  { %2574 = vmatprep.subr.bf16.mxu1 %v2698_v45 }
 0x1ec   :  { %2576 = vmatpush3.bf16.msra.mxu1 %v2575_v49 }
 0x1ed   :  { %2324 = vmatprep.subr.mxu1 %v2700_v48 }
 0x1ef   :  { %2322 = vmatmul.mubr.msk.f32.vlgmr.msra.gmra.mrb[4].mxu1 %vm53_vm0, %v2893_v50 }
 0x1f0   :  { %2326 = vmatprep.mubr.msk.f32.mxu1 %vm2699_vm3, %v2700_v48 }
 0x2ba   :  { %v2277_v51 = vpop.f32.mrb[2].mxu1 }
 0x2bb   :  { %2678 = vrcp.f32 %v2277_v51  ;;  %v385_v52 = vpop.f32.mrb[3].mxu1  ;;  %v1120_v51 = vld [vmem:[%s3228_s0 + $0x200] sm:$0xff] }
 0x2bc   :  { %2680 = vrcp.f32 %v385_v52  ;;  %v1121_v52 = vld [vmem:[%s3228_s0 + $0x208] sm:$0xff] }
 0x2c2   :  { %v699_v0 = vpop.f32.mrb[4].mxu1 }
 0x2c3   :  { %v700_v1 = vadd.f32 %v2060_v63, %v699_v0  ;;  %v2323_v2 = vpop.f32.mrb[5].mxu1  ;;  %v1128_v63 = vld [vmem:[%s3228_s0 + $0x240] sm:$0xff] }
 0x2c4   :  { %v1130_v2 = vld [vmem:[%s3228_s0 + $0x250] sm:$0xff] }
 0x2c5   :  { %v2679_v53 = vpop.eup %2678  ;;  %2325 = vmatpush3.msk.msra.mxu1 %vm708_vm4, %v700_v1  ;;  %v1129_v1 = vld [vmem:[%s3228_s0 + $0x248] sm:$0xff] }
 0x2c6   :  { %v2681_v54 = vpop.eup %2680  ;;  %v397_v56 = vmul.f32 %v2679_v53, %v2843_v12  ;;  %2327 = vmatmul.mubr.msk.f32.vlgmr.msra.gmra.mrb[6].mxu1 %vm704_vm5, %v703_v3  ;;  %2583 = vmatprep.subr.bf16.mxu1 %v2698_v45  ;;  %v2611_v3 = vpack.c.bf16 %v1130_v2, %v1129_v1 }
 0x2c7   :  { %v396_v55 = vmul.f32 %v2681_v54, %v2841_v11  ;;  %2352 = vmatprep.mubr.msk.f32.mxu1 %vm2699_vm3, %v2700_v48  ;;  %v1122_v54 = vld [vmem:[%s3228_s0 + $0x210] sm:$0xff] }
 0x2c9   :  { %2310 = vmatprep.mubr.msk.f32.mxu0 %vm218_vm2, %v396_v55  ;;  %v2599_v55 = vpack.c.bf16 %v1122_v54, %v1121_v52 }
 0x2ca   :  { %2311 = vmatmul.mubr.msk.f32.vlgmr.msra.gmra.mrb[12].mxu0 %vm218_vm2, %v397_v56  ;;  %v1123_v56 = vld [vmem:[%s3228_s0 + $0x218] sm:$0xff] }
 0x2cb   :  { %2337 = vmatprep.mubr.msk.f32.mxu0 %vm2699_vm3, %v2700_v48  ;;  %2579 = vmatpush3.bf16.msra.mxu0 %v2578_v59  ;;  %v2602_v58 = vpack.c.bf16 %v1124_v57, %v1123_v56  ;;  %v1125_v59 = vld [vmem:[%s3228_s0 + $0x228] sm:$0xff] }
 0x2cc   :  { %2580 = vmatprep.subr.bf16.mxu0 %v2698_v45  ;;  %v2605_v61 = vpack.c.bf16 %v1126_v60, %v1125_v59 }
 0x2cf   :  { %2582 = vmatpush3.bf16.msra.mxu0 %v2581_v62  ;;  %v1127_v62 = vld [vmem:[%s3228_s0 + $0x238] sm:$0xff] }
 0x2d0   :  { %2589 = vmatprep.subr.bf16.mxu0 %v2698_v45  ;;  %v2608_v0 = vpack.c.bf16 %v1128_v63, %v1127_v62 }
 0x39d   :  { %v2312_v4 = vpop.f32.mrb[12].mxu0 }
 0x39e   :  { %2682 = vtanh.f32 %v2312_v4  ;;  %v608_v6 = vpop.f32.mrb[13].mxu0  ;;  %v1131_v4 = vld [vmem:[%s3228_s0 + $0x258] sm:$0xff] }
 0x39f   :  { %2684 = vtanh.f32 %v608_v6  ;;  %v1132_v6 = vld [vmem:[%s3228_s0 + $0x260] sm:$0xff] }
 0x3a8   :  { %v2683_v7 = vpop.eup %2682 }
 0x3a9   :  { %v2685_v8 = vpop.eup %2684  ;;  %v620_v9 = vadd.f32 %v2683_v7, %v2757_v18  ;;  %v778_v18 = vpop.f32.mrb[6].mxu1  ;;  %v2614_v7 = vpack.c.bf16 %v1132_v6, %v1131_v4 }
 0x3aa   :  { %v619_v10 = vadd.f32 %v2685_v8, %v2726_v5  ;;  %v2328_v12 = vpop.f32.mrb[7].mxu1  ;;  %v783_v25 = vmul.f32 %v2949_v24, %v778_v18 }
 0x3ab   :  { %v1206_v12 = vld [vmem:[%s3228_s0 + $0x280] sm:$0xff] }
 0x3ac   :  { %2338 = vmatmul.mubr.msk.f32.vlgmr.msra.gmra.mrb[14].mxu0 %vm53_vm0, %v619_v10  ;;  %v2587_v11 = vpack.c.bf16 %v620_v9, %v619_v10  ;;  %v1133_v10 = vld [vmem:[%s3228_s0 + $0x268] sm:$0xff] }
 0x3ad   :  { %2340 = vmatprep.mubr.msk.f32.mxu0 %vm2699_vm3, %v2700_v48  ;;  %2591 = vmatpush3.bf16.msra.mxu0 %v2590_v42  ;;  %v2638_v42 = vpack.c.bf16 %v1220_v40, %v1219_v39  ;;  %v1798_v39 = vld [vmem:[%s3228_s0 + $0x390] sm:$0xff] }
 0x3ae   :  { %2592 = vmatprep.subr.bf16.mxu0 %v2698_v45 }
 0x3b0   :  { %2341 = vmatmul.mubr.msk.f32.gmra.mrb[16].mxu0 %vm53_vm0, %v620_v9 }
 0x3b1   :  { %2343 = vmatprep.mubr.msk.f32.mxu0 %vm2699_vm3, %v2700_v48  ;;  %2594 = vmatpush3.bf16.msra.mxu0 %v2593_v44  ;;  %v1223_v44 = vld [vmem:[%s3228_s0 + $0x308] sm:$0xff] }
 0x3b2   :  { %2619 = vmatprep.subr.bf16.mxu0 %v2698_v45 }
 0x3b4   :  { %2344 = vmatmul.mubr.msk.f32.gmra.mrb[18].mxu0 %vm53_vm0, %v2893_v50 }
 0x3b5   :  { %2372 = vmatprep.mubr.msk.f32.mxu0 %vm2699_vm3, %v2700_v48 }
 0x47f   :  { %v865_v5 = vpop.f32.mrb[14].mxu0 }
 0x480   :  { %v2339_v13 = vpop.f32.mrb[15].mxu0  ;;  %v866_v16 = vadd.f32 %v2064_v14, %v865_v5  ;;  %v1207_v5 = vld [vmem:[%s3228_s0 + $0x288] sm:$0xff] }
 0x481   :  { %v2620_v13 = vpack.c.bf16 %v1207_v5, %v1206_v12 }
 0x483   :  { %v870_v15 = vpop.f32.mrb[16].mxu0 }
 0x484   :  { %v871_v17 = vadd.f32 %v2064_v14, %v870_v15  ;;  %v2342_v19 = vpop.f32.mrb[17].mxu0 }
 0x485   :  { %v1209_v19 = vld [vmem:[%s3228_s0 + $0x298] sm:$0xff] }
 0x486   :  { %v2584_v20 = vpack.c.bf16 %v871_v17, %v866_v16  ;;  %v1208_v17 = vld [vmem:[%s3228_s0 + $0x290] sm:$0xff] }
 0x487   :  { %v875_v21 = vpop.f32.mrb[18].mxu0 }
 0x488   :  { %2585 = vmatpush3.bf16.xpose.msra.mxu1 %v2584_v20  ;;  %v2345_v22 = vpop.f32.mrb[19].mxu0  ;;  %v876_v23 = vadd.f32 %v2064_v14, %v875_v21  ;;  %v2623_v20 = vpack.c.bf16 %v1209_v19, %v1208_v17  ;;  %v1214_v21 = vld [vmem:[%s3228_s0 + $0x2c0] sm:$0xff] }
 0x489   :  { %2350 = vmatprep.subr.mxu1 %v2700_v48  ;;  %v1215_v22 = vld [vmem:[%s3228_s0 + $0x2c8] sm:$0xff] }
 0x490   :  { %2351 = vmatpush3.xpose.msra.mxu1 %v876_v23  ;;  %v1135_v23 = vld [vmem:[%s3228_s0 + $0x278] sm:$0xff] }
 0x491   :  { %2586 = vmatprep.subr.bf16.mxu1 %v2698_v45 }
 0x493   :  { %2353 = vmatmul.mubr.f32.vlgmr.msra.gmra.mrb[8].mxu1 %v783_v25  ;;  %v2626_v25 = vpack.c.bf16 %v1215_v22, %v1214_v21 }
 0x494   :  { %2588 = vmatpush3.bf16.msra.mxu1 %v2587_v11  ;;  %2361 = vmatprep.mubr.msk.f32.mxu1 %vm2699_vm3, %v2700_v48  ;;  %v1134_v11 = vld [vmem:[%s3228_s0 + $0x270] sm:$0xff] }
 0x495   :  { %2359 = vmatprep.subr.mxu1 %v2700_v48  ;;  %v2617_v18 = vpack.c.bf16 %v1134_v11, %v1133_v10 }
 0x498   :  { %2360 = vmatpush3.msk.msra.mxu1 %vm708_vm4, %v2893_v50  ;;  %v1119_v50 = vld [vmem:[%s3228_s0 + $0x1f8] sm:$0xff] }
 0x499   :  { %2595 = vmatprep.subr.bf16.mxu1 %v2698_v45  ;;  %v2596_v53 = vpack.c.bf16 %v1120_v51, %v1119_v50  ;;  %v1226_v50 = vld [vmem:[%s3228_s0 + $0x320] sm:$0xff] }
 0x49a   :  { %v1218_v51 = vld [vmem:[%s3228_s0 + $0x2e0] sm:$0xff] }
 0x566   :  { %v945_v26 = vpop.f32.mrb[8].mxu1 }
 0x567   :  { %v949_v28 = vmul.f32 0.17677669, %v945_v26  ;;  %v2354_v29 = vpop.f32.mrb[9].mxu1 }
 0x568   :  { %v1217_v29 = vld [vmem:[%s3228_s0 + $0x2d8] sm:$0xff] }
 0x569   :  { %v951_v31 = vmul.f32 %v950_v27, %v949_v28  ;;  %v1216_v28 = vld [vmem:[%s3228_s0 + $0x2d0] sm:$0xff] }
 0x56b   :  { %v953_v32 = vadd.f32 %v952_v30, %v951_v31  ;;  %v2629_v30 = vpack.c.bf16 %v1217_v29, %v1216_v28  ;;  %v1210_v31 = vld [vmem:[%s3228_s0 + $0x2a0] sm:$0xff]  ;;  %v1715_v29 = vld [vmem:[%s3228_s0 + $0x368] sm:$0xff] }
 0x56c   :  { %v1714_v28 = vld [vmem:[%s3228_s0 + $0x360] sm:$0xff] }
 0x56d   :  { %v955_v33 = vsel %vm954_vm6, %v953_v32, -inf }
 0x56e   :  { %956 = vmax.xlane.f32.xlu0 %v955_v33 }
 0x5fb   :  { %v957_v34 = vpop.xlane.xlu0 %956 }
 0x5fc   :  { %v958_v35 = vsub.f32 %v953_v32, %v957_v34  ;;  %v1211_v32 = vld [vmem:[%s3228_s0 + $0x2a8] sm:$0xff]  ;;  %v1212_v34 = vld [vmem:[%s3228_s0 + $0x2b0] sm:$0xff] }
 0x5fd   :  { %v2632_v33 = vpack.c.bf16 %v1211_v32, %v1210_v31  ;;  %v1795_v31 = vld [vmem:[%s3228_s0 + $0x378] sm:$0xff]  ;;  %v1796_v32 = vld [vmem:[%s3228_s0 + $0x380] sm:$0xff] }
 0x5fe   :  { %v959_v36 = vmul.f32 1.442695, %v958_v35  ;;  %v1213_v35 = vld [vmem:[%s3228_s0 + $0x2b8] sm:$0xff] }
 0x600   :  { %2686 = vpow2.f32 %v959_v36 }
 0x60a   :  { %v2687_v37 = vpop.eup %2686 }
 0x60b   :  { %v961_v38 = vsel %vm954_vm6, %v2687_v37, 0.0 }
 0x60c   :  { %962 = vadd.xlane.f32.xlu0 %v961_v38  ;;  %v2635_v38 = vpack.c.bf16 %v1213_v35, %v1212_v34 }
 0x699   :  { %v963_v46 = vpop.xlane.xlu0 %962 }
 0x69a   :  { %2688 = vrcp.f32 %v963_v46  ;;  %v2641_v46 = vpack.c.bf16 %v1222_v43, %v1221_v41  ;;  %v1879_v41 = vld [vmem:[%s3228_s0 + $0x3a8] sm:$0xff]  ;;  %v2080_v43 = vld [vmem:[%s3228_s0 + $0x370] ss:$0 sm:$0xff] }
 0x6a4   :  { %v2689_v47 = vpop.eup %2688 }
 0x6a5   :  { %v965_v49 = vmul.f32 %v2689_v47, %v2687_v37  ;;  %v1224_v47 = vld [vmem:[%s3228_s0 + $0x310] sm:$0xff] }
 0x6a7   :  { %2362 = vmatmul.mubr.msk.f32.vlgmr.msra.gmra.mrb[10].mxu1 %vm954_vm6, %v965_v49  ;;  %v1225_v49 = vld [vmem:[%s3228_s0 + $0x318] sm:$0xff] }
 0x6a8   :  { %2407 = vmatprep.mubr.msk.f32.mxu1 %vm2699_vm3, %v2700_v48  ;;  %2597 = vmatpush3.bf16.msra.mxu1 %v2596_v53 }
 0x6a9   :  { %2598 = vmatprep.subr.bf16.mxu1 %v2698_v45 }
 0x6ac   :  { %2600 = vmatpush3.bf16.msra.mxu1 %v2599_v55 }
 0x6ad   :  { %2601 = vmatprep.subr.bf16.mxu1 %v2698_v45 }
 0x6b0   :  { %2603 = vmatpush3.bf16.msra.mxu1 %v2602_v58 }
 0x6b1   :  { %2604 = vmatprep.subr.bf16.mxu1 %v2698_v45 }
 0x6b4   :  { %2606 = vmatpush3.bf16.msra.mxu1 %v2605_v61 }
 0x6b5   :  { %2607 = vmatprep.subr.bf16.mxu1 %v2698_v45 }
 0x6b8   :  { %2609 = vmatpush3.bf16.msra.mxu1 %v2608_v0 }
 0x6b9   :  { %2610 = vmatprep.subr.bf16.mxu1 %v2698_v45 }
 0x6bc   :  { %2612 = vmatpush3.bf16.msra.mxu1 %v2611_v3  ;;  %v1231_v3 = vld [vmem:[%s3228_s0 + $0x348] sm:$0xff] }
 0x6bd   :  { %2613 = vmatprep.subr.bf16.mxu1 %v2698_v45 }
 0x6c0   :  { %2615 = vmatpush3.bf16.msra.mxu1 %v2614_v7 }
 0x6c1   :  { %2616 = vmatprep.subr.bf16.mxu1 %v2698_v45 }
 0x6c4   :  { %2618 = vmatpush3.bf16.msra.mxu1 %v2617_v18 }
 0x77a   :  { %v1037_v8 = vpop.f32.mrb[10].mxu1 }
 0x77b   :  { %v2363_v9 = vpop.f32.mrb[11].mxu1  ;;  %2373 = vmatmul.mubr.msk.f32.vlgmr.msra.gmra.mrb[20].mxu0 %vm53_vm0, %v1037_v8  ;;  %v1228_v8 = vld [vmem:[%s3228_s0 + $0x330] sm:$0xff] }
 0x77c   :  { %2418 = vmatprep.mubr.msk.f32.mxu0 %vm2699_vm3, %v2700_v48  ;;  %2621 = vmatpush3.bf16.msra.mxu0 %v2620_v13  ;;  %v1227_v9 = vld [vmem:[%s3228_s0 + $0x328] sm:$0xff]  ;;  %v1230_v13 = vld [vmem:[%s3228_s0 + $0x340] sm:$0xff] }
 0x77d   :  { %2622 = vmatprep.subr.bf16.mxu0 %v2698_v45 }
 0x780   :  { %2624 = vmatpush3.bf16.msra.mxu0 %v2623_v20 }
 0x781   :  { %2625 = vmatprep.subr.bf16.mxu0 %v2698_v45 }
 0x84e   :  { %v1114_v14 = vpop.f32.mrb[20].mxu0 }
 0x84f   :  { %v1118_v15 = vmul.f32 %v1114_v14, %v2949_v24  ;;  %v2374_v16 = vpop.f32.mrb[21].mxu0  ;;  %v1229_v14 = vld [vmem:[%s3228_s0 + $0x338] sm:$0xff] }
 0x851   :  { %2408 = vmatmul.mubr.f32.vlgmr.msra.gmra.mrb[12].mxu1 %v1118_v15 }
 0x852   :  { %2456 = vmatprep.mubr.msk.f32.mxu1 %vm1535_vm7, %v1223_v44 }
 0x924   :  { %v1202_v24 = vpop.f32.mrb[12].mxu1 }
 0x925   :  { %v3066_v26 = vadd.f32 %v1202_v24, %v1135_v23  ;;  %v2409_v27 = vpop.f32.mrb[13].mxu1  ;;  %v1712_v24 = vld [vmem:[%s3228_s0 + $0x350] sm:$0xff] }
 0x927   :  { %2419 = vmatmul.mubr.msk.f32.vlgmr.msra.gmra.mrb[22].mxu0 %vm53_vm0, %v3066_v26 }
 0x928   :  { %2627 = vmatpush3.bf16.msra.mxu0 %v2626_v25  ;;  %2429 = vmatprep.mubr.msk.f32.mxu0 %vm2699_vm3, %v2700_v48  ;;  %v1713_v25 = vld [vmem:[%s3228_s0 + $0x358] sm:$0xff] }
 0x929   :  { %2628 = vmatprep.subr.bf16.mxu0 %v2698_v45  ;;  %v2650_v27 = vpack.c.bf16 %v1713_v25, %v1712_v24 }
 0x92c   :  { %2630 = vmatpush3.bf16.msra.mxu0 %v2629_v30  ;;  %v2653_v30 = vpack.c.bf16 %v1715_v29, %v1714_v28 }
 0x92d   :  { %2631 = vmatprep.subr.bf16.mxu0 %v2698_v45 }
 0x9fa   :  { %v1301_v36 = vpop.f32.mrb[22].mxu0 }
 0x9fb   :  { %v2420_v37 = vpop.f32.mrb[23].mxu0  ;;  %2430 = vmatmul.mubr.msk.f32.vlgmr.msra.gmra.mrb[24].mxu0 %vm53_vm0, %v1301_v36  ;;  %2454 = vmatprep.subr.mxu1 %v1301_v36 }
 0x9fc   :  { %2633 = vmatpush3.bf16.msra.mxu0 %v2632_v33  ;;  %2455 = vmatpush3.msra.mxu1 %v1301_v36  ;;  %v2656_v33 = vpack.c.bf16 %v1796_v32, %v1795_v31 }
 0x9fd   :  { %2634 = vmatprep.subr.bf16.mxu0 %v2698_v45  ;;  %2440 = vmatprep.mubr.msk.f32.mxu0 %vm2699_vm3, %v2700_v48 }
 0x9fe   :  { %2649 = vmatprep.subr.bf16.mxu1 %v2698_v45  ;;  %2457 = vmatmul.mubr.msk.f32.vlgmr.msra.gmra.mrb[14].mxu1 %vm1535_vm7, %v1224_v47 }
 0x9ff   :  { %2459 = vmatprep.mubr.msk.f32.mxu1 %vm1535_vm7, %v1225_v49  ;;  %2651 = vmatpush3.bf16.msra.mxu1 %v2650_v27 }
 0xa00   :  { %2636 = vmatpush3.bf16.msra.mxu0 %v2635_v38  ;;  %2652 = vmatprep.subr.bf16.mxu1 %v2698_v45  ;;  %v1797_v38 = vld [vmem:[%s3228_s0 + $0x388] sm:$0xff] }
 0xa01   :  { %2637 = vmatprep.subr.bf16.mxu0 %v2698_v45  ;;  %v2659_v40 = vpack.c.bf16 %v1798_v39, %v1797_v38 }
 0xa02   :  { %2460 = vmatmul.mubr.msk.f32.gmra.mrb[16].mxu1 %vm1535_vm7, %v1226_v50  ;;  %v1880_v50 = vld [vmem:[%s3228_s0 + $0x3b0] sm:$0xff] }
 0xa03   :  { %2441 = vmatmul.mubr.msk.f32.vlgmr.msra.gmra.mrb[26].mxu0 %vm53_vm0, %v1301_v36  ;;  %2481 = vmatprep.mubr.msk.f32.mxu1 %vm2699_vm3, %v2700_v48 }
 0xa04   :  { %2451 = vmatprep.mubr.msk.f32.mxu0 %vm2699_vm3, %v2700_v48  ;;  %2639 = vmatpush3.bf16.msra.mxu0 %v2638_v42 }
 0xa05   :  { %2640 = vmatprep.subr.bf16.mxu0 %v2698_v45  ;;  %2654 = vmatpush3.bf16.msra.mxu1 %v2653_v30 }
 0xa06   :  { %2661 = vmatprep.subr.bf16.mxu1 %v2698_v45 }
 0xa08   :  { %2642 = vmatpush3.bf16.msra.mxu0 %v2641_v46 }
 0xa09   :  { %2643 = vmatprep.subr.bf16.mxu0 %v2698_v45 }
 0xace   :  { %v1374_v52 = vpop.f32.mrb[24].mxu0 }
 0xacf   :  { %v1378_v53 = vmul.f32 %v1374_v52, %v1218_v51  ;;  %v2431_v54 = vpop.f32.mrb[25].mxu0  ;;  %v2082_v52 = vld [vmem:[%s3228_s0 + $0x398] ss:$0 sm:$0xff] }
 0xad1   :  { %v1379_v55 = vsel %vm53_vm0, %v1378_v53, 0.0  ;;  %v2458_v7 = vpop.f32.mrb[14].mxu1 }
 0xad2   :  { %v1380_v56 = vrot.slane %v1379_v55, 4  ;;  %v1614_v10 = vpop.f32.mrb[15].mxu1  ;;  %v1634_v11 = vmul.f32 %v2458_v7, %v1228_v8 }
 0xad3   :  { %v1633_v18 = vmul.f32 %v1614_v10, %v1227_v9 }
 0xad4   :  { %v1381_v57 = vadd.f32 %v1380_v56, %v1379_v55 }
 0xad5   :  { %v2644_v12 = vpack.c.bf16 %v1634_v11, %v1633_v18  ;;  %v2461_v5 = vpop.f32.mrb[16].mxu1 }
 0xad6   :  { %v1382_v58 = vrot.slane %v1381_v57, 2  ;;  %v1452_v59 = vpop.f32.mrb[26].mxu0  ;;  %v1624_v15 = vpop.f32.mrb[17].mxu1  ;;  %v1636_v16 = vmul.f32 %v2461_v5, %v1230_v13 }
 0xad7   :  { %v2442_v60 = vpop.f32.mrb[27].mxu0  ;;  %v1635_v17 = vmul.f32 %v1624_v15, %v1229_v14 }
 0xad8   :  { %v1383_v61 = vadd.f32 %v1382_v58, %v1381_v57  ;;  %v1957_v60 = vld [vmem:[%s3228_s0 + $0x3d0] sm:$0x3] }
 0xad9   :  { %v2647_v19 = vpack.c.bf16 %v1636_v16, %v1635_v17 }
 0xada   :  { %v1384_v62 = vrot.slane %v1383_v61, 1 }
 0xadc   :  { %v1385_v63 = vadd.f32 %v1384_v62, %v1383_v61  ;;  %v2085_v61 = vld [vmem:[%s3228_s0 + $0x3c0] ss:$0 sm:$0xff] }
 0xade   :  { %v1453_v0 = vadd.f32 %v1452_v59, %v1385_v63 }
 0xae0   :  { %2690 = vtanh.f32 %v1453_v0 }
 0xaea   :  { %v2691_v1 = vpop.eup %2690 }
 0xaeb   :  { %v1457_v2 = vmul.f32 1.442695, %v2691_v1 }
 0xaed   :  { %2692 = vpow2.f32 %v1457_v2 }
 0xaf7   :  { %v2693_v4 = vpop.eup %2692 }
 0xaf8   :  { %v1459_v6 = vmul.f32 %v2693_v4, %v1231_v3 }
 0xafa   :  { %2452 = vmatmul.mubr.msk.f32.vlgmr.msra.gmra.mrb[28].mxu0 %vm53_vm0, %v1459_v6 }
 0xafb   :  { %2470 = vmatprep.mubr.msk.f32.mxu0 %vm2699_vm3, %v2700_v48  ;;  %2645 = vmatpush3.bf16.msra.mxu0 %v2644_v12 }
 0xafc   :  { %2646 = vmatprep.subr.bf16.mxu0 %v2698_v45 }
 0xaff   :  { %2648 = vmatpush3.bf16.msra.mxu0 %v2647_v19 }
 0xb00   :  { %2655 = vmatprep.subr.bf16.mxu0 %v2698_v45 }
 0xbcd   :  { %v1529_v20 = vpop.f32.mrb[28].mxu0 }
 0xbce   :  { %2694 = vrcp.f32 %v1529_v20  ;;  %v2453_v21 = vpop.f32.mrb[29].mxu0 }
 0xbd8   :  { %v2695_v22 = vpop.eup %2694 }
 0xbd9   :  { %v1534_v23 = vmul.f32 %v2695_v22, %v1459_v6 }
 0xbdb   :  { %2471 = vmatmul.mubr.msk.f32.vlgmr.msra.gmra.mrb[30].mxu0 %vm53_vm0, %v1534_v23 }
 0xbdc   :  { %2492 = vmatprep.mubr.msk.f32.mxu0 %vm2699_vm3, %v2700_v48  ;;  %2657 = vmatpush3.bf16.msra.mxu0 %v2656_v33 }
 0xbdd   :  { %2658 = vmatprep.subr.bf16.mxu0 %v2698_v45 }
 0xbe0   :  { %2660 = vmatpush3.bf16.msra.mxu0 %v2659_v40 }
 0xbe1   :  { %2506 = vmatprep.subr.mxu0 %v2700_v48 }
 0xcae   :  { %v1706_v34 = vpop.f32.mrb[30].mxu0 }
 0xcaf   :  { %2696 = vtanh.f32 %v1706_v34  ;;  %v2472_v35 = vpop.f32.mrb[31].mxu0 }
 0xcb9   :  { %v2697_v36 = vpop.eup %2696 }
 0xcba   :  { %v1711_v37 = vadd.f32 %v2697_v36, %v3066_v26  ;;  %v1878_v26 = vld [vmem:[%s3228_s0 + $0x3a0] sm:$0xff] }
 0xcbb   :  { %v2662_v42 = vpack.c.bf16 %v1879_v41, %v1878_v26 }
 0xcbc   :  { %2482 = vmatmul.mubr.msk.f32.vlgmr.msra.gmra.mrb[18].mxu1 %vm53_vm0, %v1711_v37 }
 0xcbd   :  { %2503 = vmatprep.mubr.msk.f32.mxu1 %vm2699_vm3, %v2700_v48  ;;  %2663 = vmatpush3.bf16.msra.mxu1 %v2662_v42 }
 0xcbe   :  { %2664 = vmatprep.subr.bf16.mxu1 %v2698_v45  ;;  %v1881_v45 = vld [vmem:[%s3228_s0 + $0x3b8] sm:$0xff] }
 0xcbf   :  { %v2665_v51 = vpack.c.bf16 %v1881_v45, %v1880_v50 }
 0xcc1   :  { %2666 = vmatpush3.bf16.msra.mxu1 %v2665_v51 }
 0xd8f   :  { %v1790_v44 = vpop.f32.mrb[18].mxu1 }
 0xd90   :  { %v1791_v46 = vadd.f32 %v2080_v43, %v1790_v44  ;;  %v2483_v47 = vpop.f32.mrb[19].mxu1 }
 0xd92   :  { %v1794_v49 = vmax.f32 %v1791_v46, 0.0 }
 0xd94   :  { %2493 = vmatmul.mubr.msk.f32.vlgmr.msra.gmra.mrb[32].mxu0 %vm53_vm0, %v1794_v49 }
 0xd95   :  { %2508 = vmatprep.mubr.msk.f32.mxu0 %vm2699_vm3, %v2700_v48  ;;  %v1955_v48 = vld [vmem:[%s3228_s0 + $0x3c8] sm:$0xff] }
 0xe67   :  { %v1873_v53 = vpop.f32.mrb[32].mxu0 }
 0xe68   :  { %v1874_v54 = vadd.f32 %v2082_v52, %v1873_v53  ;;  %v2494_v55 = vpop.f32.mrb[33].mxu0 }
 0xe6a   :  { %v1877_v56 = vmax.f32 %v1874_v54, 0.0 }
 0xe6c   :  { %2504 = vmatmul.mubr.msk.f32.vlgmr.msra.gmra.mrb[20].mxu1 %vm53_vm0, %v1877_v56 }
 0xf3f   :  { %v1951_v57 = vpop.f32.mrb[20].mxu1 }
 0xf40   :  { %v1956_v58 = vmul.f32 %v1955_v48, %v1951_v57  ;;  %v2505_v59 = vpop.f32.mrb[21].mxu1 }
 0xf42   :  { %2507 = vmatpush3.msra.mxu0 %v1956_v58 }
 0xf43   :  { %2509 = vmatmul.mubr.msk.f32.vlgmr.msra.gmra.mrb[34].mxu0 %vm1535_vm7, %v1957_v60 }
0x1016   :  { %v2032_v62 = vpop.f32.mrb[34].mxu0 }
0x1017   :  { %v2033_v63 = vadd.f32 %v2085_v61, %v2032_v62  ;;  %v2510_v0 = vpop.f32.mrb[35].mxu0 }
0x1019   :  { %2037 = vst.msk [vmem:[%s3229_s1] sm:$0x3] %vm2036_vm8, %v2033_v63 }

</bundles_post_ra>
